<compile_context>
chip_gen: v5e
topology: v5e:2x2
jax: 0.10.0
libtpu: 0.0.40
codegen_flags: <defaults>
</compile_context>

<pallas_src>
import functools

import jax
import jax.numpy as jnp
import numpy as np
from jax import lax
from jax.experimental import pallas as pl
from jax.experimental.pallas import tpu as pltpu


def _simple_cnn_kernel(xcat_ref, w1_ref, b1_ref, w2_ref, b2_ref, w3_ref, b3_ref,
                       pool_ref, wfc_ref, bfc_ref, out_ref, *, H):
    f32 = jnp.float32
    R = xcat_ref.shape[0]                                        # TB * H rows (b, h)

    x = xcat_ref[...]                                            # (R, W*3C)

    # --- conv1: Conv2d(C,16,(3,1),'same') + ReLU --------------------------------
    # one matmul against the block-diagonal weight: K = W*3C, N = W*16 (lane dense)
    h1 = jnp.dot(x, w1_ref[...], preferred_element_type=f32)
    h1 = jnp.maximum(h1 + b1_ref[...], 0.0)                      # (R, W*16), cols (w, co)

    # --- conv2: Conv2d(16,16,(1,W)) + ReLU ---------------------------------------
    # full-width contraction fused into ONE matmul with K = W*16
    h2 = jnp.dot(h1, w2_ref[...], preferred_element_type=f32)
    h2 = jnp.maximum(h2 + b2_ref[...], 0.0)                      # (R, 16)

    # --- conv3: Conv2d(16,16,(3,1),'same') + ReLU --------------------------------
    # fused weight (16, 48): one MXU push, then zero-padded shifts along the row
    # axis; rows at batch boundaries (h==0 / h==H-1) are masked so the shift
    # never mixes neighbouring batches.
    u = jnp.dot(h2, w3_ref[...], preferred_element_type=f32)     # (R, 48)
    u0 = u[:, 0:16]                                              # tap kh=0 (needs h-1)
    u1 = u[:, 16:32]                                             # tap kh=1
    u2 = u[:, 32:48]                                             # tap kh=2 (needs h+1)
    zero_row = jnp.zeros((1, 16), f32)
    u0s = jnp.concatenate([zero_row, u0[:-1, :]], axis=0)        # row r <- u0[r-1]
    u2s = jnp.concatenate([u2[1:, :], zero_row], axis=0)         # row r <- u2[r+1]
    h_idx = lax.broadcasted_iota(jnp.int32, (R, 1), 0) % H       # h position of each row
    u0s = jnp.where(h_idx == 0, 0.0, u0s)                        # no h-1 at h==0
    u2s = jnp.where(h_idx == (H - 1), 0.0, u2s)                  # no h+1 at h==H-1
    h3 = jnp.maximum(u0s + u1 + u2s + b3_ref[...], 0.0)          # (R, 16)

    # --- mean over (H, W_out=1) via per-tile pooling matmul, then fc + sigmoid ---
    pooled = jnp.dot(pool_ref[...], h3, preferred_element_type=f32)      # (TB, 16)
    logit = jnp.dot(pooled, wfc_ref[...], preferred_element_type=f32) + bfc_ref[...]
    out_ref[...] = jax.nn.sigmoid(logit)                         # (TB, 1)


def simple_cnn_forward(x, params):
    """x: (B, C, H, W) float32 (PyTorch NCHW). params: torch-shaped weights."""
    W1, b1, W2, b2, W3, b3, Wfc, bfc = params
    B, C, H, W = x.shape
    f32 = jnp.float32

    # ---- pick a batch-tile so each grid step sees ~256 (b, h) rows ---------------
    ROWS_TARGET = 256
    TB = max(8, ROWS_TARGET // max(H, 1))
    TB -= TB % 8                            # keep blocks (8,128)-friendly when grid > 1
    if B <= TB:
        TB = B                              # single tile: blocks equal full array dims
    n_tiles = -(-B // TB)
    B_pad = n_tiles * TB
    R = TB * H                              # rows per grid step

    # ---- glue: NCHW -> (B_pad*H, W*3*C) with the three 'same'-padded H shifts ----
    x_bhwc = jnp.transpose(x, (0, 2, 3, 1))                          # (B, H, W, C)
    x_pad = jnp.pad(x_bhwc, ((0, B_pad - B), (1, 1), (0, 0), (0, 0)))
    xcat = jnp.stack([x_pad[:, k:k + H] for k in range(3)], axis=3)  # (B_pad, H, W, 3, C)
    xcat = xcat.reshape(B_pad * H, W * 3 * C)                        # cols (w, kh, c)

    # ---- glue: weights rearranged for the matmul formulation ---------------------
    w1k = jnp.transpose(W1[:, :, :, 0], (2, 1, 0)).reshape(3 * C, 16)        # rows (kh, c)
    w1_blk = jnp.kron(jnp.eye(W, dtype=f32), w1k)                            # (W*3C, W*16)
    b1_t = jnp.tile(b1, W).reshape(1, W * 16)
    w2_flat = jnp.transpose(W2[:, :, 0, :], (2, 1, 0)).reshape(W * 16, 16)   # rows (w, ci)
    w3_fused = jnp.transpose(W3[:, :, :, 0], (1, 2, 0)).reshape(16, 3 * 16)  # cols (kh, co)
    wfc_r = Wfc.T                                                            # (16, 1)
    # per-tile mean-pool matrix: (TB, TB*H), block-diagonal rows of 1/H
    pool = jnp.kron(jnp.eye(TB, dtype=f32), jnp.full((1, H), 1.0 / H, f32))

    flops_tile = (2 * R * (W * 3 * C) * (W * 16)   # conv1 (block-diag, as executed)
                  + 2 * R * (W * 16) * 16          # conv2 fused K=W*16
                  + 2 * R * 16 * 48                # conv3 fused
                  + 2 * TB * R * 16                # mean-pool matmul
                  + 2 * TB * 16)                   # fc
    bytes_accessed = 4 * (xcat.size + w1_blk.size + b1_t.size + w2_flat.size + 16
                          + w3_fused.size + 16 + pool.size + 16 + 1 + B_pad)
    cost = pl.CostEstimate(flops=int(n_tiles * flops_tile), transcendentals=int(B_pad),
                           bytes_accessed=int(bytes_accessed))

    out = pl.pallas_call(
        functools.partial(_simple_cnn_kernel, H=H),
        out_shape=jax.ShapeDtypeStruct((B_pad, 1), f32),
        grid=(n_tiles,),
        in_specs=[
            pl.BlockSpec((R, W * 3 * C), lambda t: (t, 0)),       # per-tile activations
            pl.BlockSpec((W * 3 * C, W * 16), lambda t: (0, 0)),  # conv1 block-diag weight
            pl.BlockSpec((1, W * 16), lambda t: (0, 0)),          # conv1 bias (tiled)
            pl.BlockSpec((W * 16, 16), lambda t: (0, 0)),         # conv2 fused weight
            pl.BlockSpec((1, 16), lambda t: (0, 0)),              # conv2 bias
            pl.BlockSpec((16, 48), lambda t: (0, 0)),             # conv3 fused weight
            pl.BlockSpec((1, 16), lambda t: (0, 0)),              # conv3 bias
            pl.BlockSpec((TB, R), lambda t: (0, 0)),              # per-tile pooling matrix
            pl.BlockSpec((16, 1), lambda t: (0, 0)),              # fc weight
            pl.BlockSpec((1, 1), lambda t: (0, 0)),               # fc bias
        ],
        out_specs=pl.BlockSpec((TB, 1), lambda t: (t, 0)),
        compiler_params=pltpu.CompilerParams(
            dimension_semantics=("parallel",)),
        cost_estimate=cost,
    )(xcat, w1_blk, b1_t, w2_flat, b2.reshape(1, 16),
      w3_fused, b3.reshape(1, 16), pool, wfc_r, bfc.reshape(1, 1))
    return out[:B]


def simple_cnn_ref(x, params):
    """Pure-JAX reference matching the PyTorch forward exactly."""
    W1, b1, W2, b2, W3, b3, Wfc, bfc = params
    dn = ('NCHW', 'OIHW', 'NCHW')
    h = lax.conv_general_dilated(x, W1, (1, 1), [(1, 1), (0, 0)], dimension_numbers=dn)
    h = jax.nn.relu(h + b1[None, :, None, None])
    h = lax.conv_general_dilated(h, W2, (1, 1), [(0, 0), (0, 0)], dimension_numbers=dn)
    h = jax.nn.relu(h + b2[None, :, None, None])
    h = lax.conv_general_dilated(h, W3, (1, 1), [(1, 1), (0, 0)], dimension_numbers=dn)
    h = jax.nn.relu(h + b3[None, :, None, None])
    h = jnp.mean(h, axis=(2, 3))
    return jax.nn.sigmoid(h @ Wfc.T + bfc[None, :])


if __name__ == "__main__":
    B, C, H, W = 2, 4, 16, 16          # batch=2, n_channel=4, height=16, width=16
    key = jax.random.PRNGKey(0)
    ks = jax.random.split(key, 9)
    x = jax.random.normal(ks[0], (B, C, H, W), jnp.float32)
    params = (
        0.1 * jax.random.normal(ks[1], (16, C, 3, 1), jnp.float32),   # conv1.weight
        0.1 * jax.random.normal(ks[2], (16,), jnp.float32),           # conv1.bias
        0.1 * jax.random.normal(ks[3], (16, 16, 1, W), jnp.float32),  # conv2.weight
        0.1 * jax.random.normal(ks[4], (16,), jnp.float32),           # conv2.bias
        0.1 * jax.random.normal(ks[5], (16, 16, 3, 1), jnp.float32),  # conv3.weight
        0.1 * jax.random.normal(ks[6], (16,), jnp.float32),           # conv3.bias
        0.1 * jax.random.normal(ks[7], (1, 16), jnp.float32),         # fc.weight
        0.1 * jax.random.normal(ks[8], (1,), jnp.float32),            # fc.bias
    )

    out = jax.jit(simple_cnn_forward)(x, params)
    out = jax.block_until_ready(out)

    ref = simple_cnn_ref(x, params)
    np.testing.assert_allclose(np.asarray(out), np.asarray(ref), atol=2e-3, rtol=2e-3)
    assert out.shape == (B, 1)
    print("KERNEL_OK")
</pallas_src>

<mosaic_0001>
module attributes {stable_mosaic.version = 11 : i64} {
  func.func @_simple_cnn_kernel(%arg0: i32, %arg1: memref<32x192xf32, #tpu.memory_space<vmem>>, %arg2: memref<192x256xf32, #tpu.memory_space<vmem>>, %arg3: memref<1x256xf32, #tpu.memory_space<vmem>>, %arg4: memref<256x16xf32, #tpu.memory_space<vmem>>, %arg5: memref<1x16xf32, #tpu.memory_space<vmem>>, %arg6: memref<16x48xf32, #tpu.memory_space<vmem>>, %arg7: memref<1x16xf32, #tpu.memory_space<vmem>>, %arg8: memref<2x32xf32, #tpu.memory_space<vmem>>, %arg9: memref<16x1xf32, #tpu.memory_space<vmem>>, %arg10: memref<1x1xf32, #tpu.memory_space<vmem>>, %arg11: memref<2x1xf32, #tpu.memory_space<vmem>>) attributes {dimension_semantics = [#tpu.dimension_semantics<parallel>], iteration_bounds = array<i64: 1>, scalar_prefetch = 0 : i64, scratch_operands = 0 : i64, tpu.core_type = #tpu.core_type<tc>, window_params = [{transform_indices = @transform_0, window_bounds = array<i64: 32, 192>}, {pipeline_mode = #tpu.pipeline_mode<synchronous>, transform_indices = @transform_1, window_bounds = array<i64: 192, 256>}, {pipeline_mode = #tpu.pipeline_mode<synchronous>, transform_indices = @transform_2, window_bounds = array<i64: 1, 256>}, {pipeline_mode = #tpu.pipeline_mode<synchronous>, transform_indices = @transform_3, window_bounds = array<i64: 256, 16>}, {pipeline_mode = #tpu.pipeline_mode<synchronous>, transform_indices = @transform_4, window_bounds = array<i64: 1, 16>}, {pipeline_mode = #tpu.pipeline_mode<synchronous>, transform_indices = @transform_5, window_bounds = array<i64: 16, 48>}, {pipeline_mode = #tpu.pipeline_mode<synchronous>, transform_indices = @transform_6, window_bounds = array<i64: 1, 16>}, {pipeline_mode = #tpu.pipeline_mode<synchronous>, transform_indices = @transform_7, window_bounds = array<i64: 2, 32>}, {pipeline_mode = #tpu.pipeline_mode<synchronous>, transform_indices = @transform_8, window_bounds = array<i64: 16, 1>}, {pipeline_mode = #tpu.pipeline_mode<synchronous>, transform_indices = @transform_9, window_bounds = array<i64: 1, 1>}, {transform_indices = @transform_10, window_bounds = array<i64: 2, 1>}]} {
    %c0 = arith.constant 0 : index
    %c0_0 = arith.constant 0 : index
    %0 = vector.load %arg1[%c0, %c0_0] : memref<32x192xf32, #tpu.memory_space<vmem>>, vector<32x192xf32>
    %c0_1 = arith.constant 0 : index
    %c0_2 = arith.constant 0 : index
    %1 = vector.load %arg2[%c0_1, %c0_2] : memref<192x256xf32, #tpu.memory_space<vmem>>, vector<192x256xf32>
    %cst = arith.constant dense<0.000000e+00> : vector<32x256xf32>
    %2 = tpu.matmul %0, %1, %cst {dimension_numbers = #tpu.dot_dimension_numbers<[1], [0], [0], [1], [0, 0, 1, 1], [], []>} : vector<32x192xf32>, vector<192x256xf32>, vector<32x256xf32> -> vector<32x256xf32>
    %c0_3 = arith.constant 0 : index
    %c0_4 = arith.constant 0 : index
    %3 = vector.load %arg3[%c0_3, %c0_4] : memref<1x256xf32, #tpu.memory_space<vmem>>, vector<1x256xf32>
    %4 = vector.broadcast %3 : vector<1x256xf32> to vector<32x256xf32>
    %5 = arith.addf %2, %4 : vector<32x256xf32>
    %cst_5 = arith.constant 0.000000e+00 : f32
    %6 = vector.broadcast %cst_5 : f32 to vector<32x256xf32>
    %7 = arith.maximumf %5, %6 : vector<32x256xf32>
    %c0_6 = arith.constant 0 : index
    %c0_7 = arith.constant 0 : index
    %8 = vector.load %arg4[%c0_6, %c0_7] : memref<256x16xf32, #tpu.memory_space<vmem>>, vector<256x16xf32>
    %cst_8 = arith.constant dense<0.000000e+00> : vector<32x16xf32>
    %9 = tpu.matmul %7, %8, %cst_8 {dimension_numbers = #tpu.dot_dimension_numbers<[1], [0], [0], [1], [0, 0, 1, 1], [], []>} : vector<32x256xf32>, vector<256x16xf32>, vector<32x16xf32> -> vector<32x16xf32>
    %c0_9 = arith.constant 0 : index
    %c0_10 = arith.constant 0 : index
    %10 = vector.load %arg5[%c0_9, %c0_10] : memref<1x16xf32, #tpu.memory_space<vmem>>, vector<1x16xf32>
    %11 = vector.broadcast %10 : vector<1x16xf32> to vector<32x16xf32>
    %12 = arith.addf %9, %11 : vector<32x16xf32>
    %cst_11 = arith.constant 0.000000e+00 : f32
    %13 = vector.broadcast %cst_11 : f32 to vector<32x16xf32>
    %14 = arith.maximumf %12, %13 : vector<32x16xf32>
    %c0_12 = arith.constant 0 : index
    %c0_13 = arith.constant 0 : index
    %15 = vector.load %arg6[%c0_12, %c0_13] : memref<16x48xf32, #tpu.memory_space<vmem>>, vector<16x48xf32>
    %cst_14 = arith.constant dense<0.000000e+00> : vector<32x48xf32>
    %16 = tpu.matmul %14, %15, %cst_14 {dimension_numbers = #tpu.dot_dimension_numbers<[1], [0], [0], [1], [0, 0, 1, 1], [], []>} : vector<32x16xf32>, vector<16x48xf32>, vector<32x48xf32> -> vector<32x48xf32>
    %17 = vector.extract_strided_slice %16 {offsets = [0, 0], sizes = [32, 16], strides = [1, 1]} : vector<32x48xf32> to vector<32x16xf32>
    %18 = vector.extract_strided_slice %16 {offsets = [0, 16], sizes = [32, 16], strides = [1, 1]} : vector<32x48xf32> to vector<32x16xf32>
    %19 = vector.extract_strided_slice %16 {offsets = [0, 32], sizes = [32, 16], strides = [1, 1]} : vector<32x48xf32> to vector<32x16xf32>
    %cst_15 = arith.constant 0.000000e+00 : f32
    %20 = vector.broadcast %cst_15 : f32 to vector<1x16xf32>
    %21 = vector.extract_strided_slice %17 {offsets = [0, 0], sizes = [31, 16], strides = [1, 1]} : vector<32x16xf32> to vector<31x16xf32>
    %22 = tpu.concatenate %20, %21 in 0 : vector<1x16xf32>, vector<31x16xf32> -> vector<32x16xf32>
    %23 = vector.extract_strided_slice %19 {offsets = [1, 0], sizes = [31, 16], strides = [1, 1]} : vector<32x16xf32> to vector<31x16xf32>
    %24 = tpu.concatenate %23, %20 in 0 : vector<31x16xf32>, vector<1x16xf32> -> vector<32x16xf32>
    %25 = tpu.iota {dimensions = array<i32: 0>} : vector<32x1xi32>
    %c16_i32 = arith.constant 16 : i32
    %c0_i32 = arith.constant 0 : i32
    %26 = arith.cmpi eq, %c16_i32, %c0_i32 : i32
    %c1_i32 = arith.constant 1 : i32
    %27 = arith.select %26, %c1_i32, %c16_i32 : i32
    %28 = vector.broadcast %27 : i32 to vector<32x1xi32>
    %29 = arith.remsi %25, %28 : vector<32x1xi32>
    %c0_i32_16 = arith.constant 0 : i32
    %30 = vector.broadcast %c0_i32_16 : i32 to vector<32x1xi32>
    %31 = arith.cmpi ne, %29, %30 : vector<32x1xi32>
    %c0_i32_17 = arith.constant 0 : i32
    %32 = vector.broadcast %c0_i32_17 : i32 to vector<32x1xi32>
    %33 = arith.cmpi slt, %29, %32 : vector<32x1xi32>
    %c0_i32_18 = arith.constant 0 : i32
    %34 = arith.cmpi slt, %27, %c0_i32_18 : i32
    %35 = vector.broadcast %34 : i1 to vector<32x1xi1>
    %36 = vector.broadcast %35 : vector<32x1xi1> to vector<32x1xi1>
    %37 = arith.xori %33, %36 : vector<32x1xi1>
    %38 = arith.andi %37, %31 : vector<32x1xi1>
    %39 = vector.broadcast %27 : i32 to vector<32x1xi32>
    %40 = arith.addi %29, %39 : vector<32x1xi32>
    %41 = arith.select %38, %40, %29 : vector<32x1xi1>, vector<32x1xi32>
    %c0_i32_19 = arith.constant 0 : i32
    %42 = vector.broadcast %c0_i32_19 : i32 to vector<32x1xi32>
    %43 = arith.cmpi eq, %41, %42 : vector<32x1xi32>
    %cst_20 = arith.constant 0.000000e+00 : f32
    %44 = vector.shape_cast %43 : vector<32x1xi1> to vector<32x1xi1>
    %45 = vector.broadcast %44 : vector<32x1xi1> to vector<32x16xi1>
    %46 = vector.broadcast %cst_20 : f32 to vector<32x16xf32>
    %47 = arith.select %45, %46, %22 : vector<32x16xi1>, vector<32x16xf32>
    %c15_i32 = arith.constant 15 : i32
    %48 = vector.broadcast %c15_i32 : i32 to vector<32x1xi32>
    %49 = arith.cmpi eq, %41, %48 : vector<32x1xi32>
    %cst_21 = arith.constant 0.000000e+00 : f32
    %50 = vector.shape_cast %49 : vector<32x1xi1> to vector<32x1xi1>
    %51 = vector.broadcast %50 : vector<32x1xi1> to vector<32x16xi1>
    %52 = vector.broadcast %cst_21 : f32 to vector<32x16xf32>
    %53 = arith.select %51, %52, %24 : vector<32x16xi1>, vector<32x16xf32>
    %54 = arith.addf %47, %18 : vector<32x16xf32>
    %55 = arith.addf %54, %53 : vector<32x16xf32>
    %c0_22 = arith.constant 0 : index
    %c0_23 = arith.constant 0 : index
    %56 = vector.load %arg7[%c0_22, %c0_23] : memref<1x16xf32, #tpu.memory_space<vmem>>, vector<1x16xf32>
    %57 = vector.broadcast %56 : vector<1x16xf32> to vector<32x16xf32>
    %58 = arith.addf %55, %57 : vector<32x16xf32>
    %cst_24 = arith.constant 0.000000e+00 : f32
    %59 = vector.broadcast %cst_24 : f32 to vector<32x16xf32>
    %60 = arith.maximumf %58, %59 : vector<32x16xf32>
    %c0_25 = arith.constant 0 : index
    %c0_26 = arith.constant 0 : index
    %61 = vector.load %arg8[%c0_25, %c0_26] : memref<2x32xf32, #tpu.memory_space<vmem>>, vector<2x32xf32>
    %cst_27 = arith.constant dense<0.000000e+00> : vector<2x16xf32>
    %62 = tpu.matmul %61, %60, %cst_27 {dimension_numbers = #tpu.dot_dimension_numbers<[1], [0], [0], [1], [0, 0, 1, 1], [], []>} : vector<2x32xf32>, vector<32x16xf32>, vector<2x16xf32> -> vector<2x16xf32>
    %c0_28 = arith.constant 0 : index
    %c0_29 = arith.constant 0 : index
    %63 = vector.load %arg9[%c0_28, %c0_29] : memref<16x1xf32, #tpu.memory_space<vmem>>, vector<16x1xf32>
    %cst_30 = arith.constant dense<0.000000e+00> : vector<2x1xf32>
    %64 = tpu.matmul %62, %63, %cst_30 {dimension_numbers = #tpu.dot_dimension_numbers<[1], [0], [0], [1], [0, 0, 1, 1], [], []>} : vector<2x16xf32>, vector<16x1xf32>, vector<2x1xf32> -> vector<2x1xf32>
    %c0_31 = arith.constant 0 : index
    %c0_32 = arith.constant 0 : index
    %65 = vector.load %arg10[%c0_31, %c0_32] : memref<1x1xf32, #tpu.memory_space<vmem>>, vector<1x1xf32>
    %66 = vector.broadcast %65 : vector<1x1xf32> to vector<2x1xf32>
    %67 = arith.addf %64, %66 : vector<2x1xf32>
    %68 = arith.negf %67 : vector<2x1xf32>
    %69 = math.exp %68 : vector<2x1xf32>
    %cst_33 = arith.constant 1.000000e+00 : f32
    %70 = vector.broadcast %cst_33 : f32 to vector<2x1xf32>
    %71 = arith.addf %70, %69 : vector<2x1xf32>
    %72 = arith.divf %70, %71 : vector<2x1xf32>
    %c0_34 = arith.constant 0 : index
    %c0_35 = arith.constant 0 : index
    %73 = vector.load %arg11[%c0_34, %c0_35] : memref<2x1xf32, #tpu.memory_space<vmem>>, vector<2x1xf32>
    tpu.vector_store %arg11[%c0_34, %c0_35], %72 {strides = array<i32>} : memref<2x1xf32, #tpu.memory_space<vmem>>, vector<2x1xf32>,
    return
  }
  func.func @transform_0(%arg0: i32) -> (i32, i32) {
    %c0_i32 = arith.constant 0 : i32
    %c0_i32_0 = arith.constant 0 : i32
    return %arg0, %c0_i32 : i32, i32
  }
  func.func @transform_1(%arg0: i32) -> (i32, i32) {
    %c0_i32 = arith.constant 0 : i32
    %c0_i32_0 = arith.constant 0 : i32
    %c0_i32_1 = arith.constant 0 : i32
    return %c0_i32, %c0_i32_0 : i32, i32
  }
  func.func @transform_2(%arg0: i32) -> (i32, i32) {
    %c0_i32 = arith.constant 0 : i32
    %c0_i32_0 = arith.constant 0 : i32
    %c0_i32_1 = arith.constant 0 : i32
    return %c0_i32, %c0_i32_0 : i32, i32
  }
  func.func @transform_3(%arg0: i32) -> (i32, i32) {
    %c0_i32 = arith.constant 0 : i32
    %c0_i32_0 = arith.constant 0 : i32
    %c0_i32_1 = arith.constant 0 : i32
    return %c0_i32, %c0_i32_0 : i32, i32
  }
  func.func @transform_4(%arg0: i32) -> (i32, i32) {
    %c0_i32 = arith.constant 0 : i32
    %c0_i32_0 = arith.constant 0 : i32
    %c0_i32_1 = arith.constant 0 : i32
    return %c0_i32, %c0_i32_0 : i32, i32
  }
  func.func @transform_5(%arg0: i32) -> (i32, i32) {
    %c0_i32 = arith.constant 0 : i32
    %c0_i32_0 = arith.constant 0 : i32
    %c0_i32_1 = arith.constant 0 : i32
    return %c0_i32, %c0_i32_0 : i32, i32
  }
  func.func @transform_6(%arg0: i32) -> (i32, i32) {
    %c0_i32 = arith.constant 0 : i32
    %c0_i32_0 = arith.constant 0 : i32
    %c0_i32_1 = arith.constant 0 : i32
    return %c0_i32, %c0_i32_0 : i32, i32
  }
  func.func @transform_7(%arg0: i32) -> (i32, i32) {
    %c0_i32 = arith.constant 0 : i32
    %c0_i32_0 = arith.constant 0 : i32
    %c0_i32_1 = arith.constant 0 : i32
    return %c0_i32, %c0_i32_0 : i32, i32
  }
  func.func @transform_8(%arg0: i32) -> (i32, i32) {
    %c0_i32 = arith.constant 0 : i32
    %c0_i32_0 = arith.constant 0 : i32
    %c0_i32_1 = arith.constant 0 : i32
    return %c0_i32, %c0_i32_0 : i32, i32
  }
  func.func @transform_9(%arg0: i32) -> (i32, i32) {
    %c0_i32 = arith.constant 0 : i32
    %c0_i32_0 = arith.constant 0 : i32
    %c0_i32_1 = arith.constant 0 : i32
    return %c0_i32, %c0_i32_0 : i32, i32
  }
  func.func @transform_10(%arg0: i32) -> (i32, i32) {
    %c0_i32 = arith.constant 0 : i32
    %c0_i32_0 = arith.constant 0 : i32
    return %arg0, %c0_i32 : i32, i32
  }
}

</mosaic_0001>

<bundles_post_ra>
// kernel: mul.4
= control target key start
LH: loop header
LB: loop body
LE: loop exit
PB: predicated region body
PF: predicated region fallthrough
CT: control target
= control target key end

     0   :  { %vm15_vm0 = vcmask 130048   ;;  %s59_s0 = inlined_call_operand.vmem [shape: f32[3,4,16], index: 0, kind: input, shape index: {}]   ;;  %s60_s1 = inlined_call_operand.vmem [shape: f32[12,16], index: 1, kind: output, shape index: {}]  }
   0x1   :  { %v27_v0 = vld [vmem:[%s59_s0 + $0x8] sm:$0xf]  ;;  %v28_v1 = vld [vmem:[%s59_s0 + $0x4] sm:$0xf]  ;;  %v12_v2 = vld [vmem:[%s59_s0] sm:$0xf] }
   0x2   :  { %7 = vst [vmem:[#allocation0] sm:$0xf] %v27_v0 }
   0x3   :  { %11 = vst [vmem:[#allocation0 + $0x10] sm:$0xf] %v28_v1 }
   0x4   :  { %13 = vst [vmem:[#allocation0 + $0x8] sm:$0xf] %v12_v2 }
   0x9   :  { %v23_v3 = vld [vmem:[#allocation0] sm:$0xf]  }
   0xa   :  { %v18_v4 = vld [vmem:[#allocation0 + $0x10] sm:$0xf]   ;;  %30 = vst.msk [vmem:[%s60_s1 + $0x8] sm:$0xf] %vm15_vm0, %v23_v3  }
   0xb   :  { %v14_v5 = vld [vmem:[#allocation0 + $0x8] sm:$0xf]   ;;  %29 = vst.msk [vmem:[%s60_s1 + $0x4] sm:$0xf] %vm15_vm0, %v18_v4  }
   0xc   :  { %16 = vst.msk [vmem:[%s60_s1] sm:$0xf] %vm15_vm0, %v14_v5  }

// kernel: tile.8
= control target key start
LH: loop header
LB: loop body
LE: loop exit
PB: predicated region body
PF: predicated region fallthrough
CT: control target
= control target key end

     0   :  { %s28_s0 = inlined_call_operand.vmem [shape: f32[16], index: 0, kind: input, shape index: {}]   ;;  %s29_s1 = inlined_call_operand.vmem [shape: f32[16,16], index: 1, kind: output, shape index: {}]  }
   0x1   :  { %v4_v0 = vld [vmem:[%s28_s0] ss:$0 sm:$0xff] }
   0x2   :  { %5 = vst [vmem:[%s29_s1] sm:$0xff] %v4_v0 }
   0x3   :  { %8 = vst [vmem:[%s29_s1 + $0x8] sm:$0xff] %v4_v0 }

// kernel: tile.9
= control target key start
LH: loop header
LB: loop body
LE: loop exit
PB: predicated region body
PF: predicated region fallthrough
CT: control target
= control target key end

     0   :  { %s7_s6 = smov 3  ;;  %s21_s9 = smov 3  ;;  %vm4_vm0 = vcmask 130048   ;;  %vm11_vm1 = vcmask 1048448   ;;  %vm18_vm2 = vcmask 917248   ;;  %vm25_vm3 = vcmask 786048   ;;  %s129_s0 = inlined_call_operand.vmem [shape: f32[16,16], index: 0, kind: input, shape index: {}]   ;;  %s130_s1 = inlined_call_operand.vmem [shape: f32[1,256], index: 1, kind: output, shape index: {}]  }
   0x1   :  { %v67_v0 = vld [vmem:[%s129_s0 + $0x7] ss:$8 sm:%s7_s6]   ;;  %s82_s10 = smov 112   ;;  %v69_v1 = vld [vmem:[%s129_s0 + $0x5] ss:$8 sm:%s21_s9]   ;;  %s83_s13 = smov 80  }
   0x2   :  { %9 = vrot.lane.b32.xlu0 %v67_v0, %s82_s10  ;;  %23 = vrot.lane.b32.xlu1 %v69_v1, %s83_s13  ;;  %s14_s14 = smov 3  ;;  %s28_s15 = smov 3  ;;  %vm32_vm4 = vcmask 654848   ;;  %vm39_vm5 = vcmask 523648   ;;  %vm46_vm6 = vcmask 392448   ;;  %vm53_vm7 = vcmask 261248  }
   0x3   :  { %s35_s16 = smov 3  ;;  %v68_v3 = vld [vmem:[%s129_s0 + $0x6] ss:$8 sm:%s14_s14]   ;;  %s84_s21 = smov 48   ;;  %v70_v4 = vld [vmem:[%s129_s0 + $0x4] ss:$8 sm:%s28_s15]  }
   0x4   :  { %v71_v2 = vld [vmem:[%s129_s0 + $0x3] ss:$8 sm:%s35_s16]   ;;  %s42_s24 = smov 3  ;;  %s85_s25 = smov 96  }
   0x5   :  { %37 = vrot.lane.b32.xlu2 %v71_v2, %s84_s21  ;;  %s86_s26 = smov 64   ;;  %s49_s27 = smov 3  ;;  %v72_v5 = vld [vmem:[%s129_s0 + $0x2] ss:$8 sm:%s42_s24]  }
   0x6   :  { %v73_v6 = vld [vmem:[%s129_s0 + $0x1] ss:$8 sm:%s49_s27]   ;;  %s87_s3 = smov 32   ;;  %s88_s4 = smov 16  }
   0x7   :  { %s2_s5 = smov 3 }
   0x8   :  { %v3_v7 = vld [vmem:[%s129_s0] ss:$8 sm:%s2_s5]  }
   0x9   :  { %5 = vst.msk [vmem:[#allocation0] ss:$8 sm:$0x3] %vm4_vm0, %v3_v7  }
   0xa   :  { %16 = vrot.lane.b32.xlu0 %v68_v3, %s85_s25  ;;  %30 = vrot.lane.b32.xlu1 %v70_v4, %s86_s26 }
   0xd   :  { %44 = vrot.lane.b32.xlu2 %v72_v5, %s87_s3 }
  0x12   :  { %51 = vrot.lane.b32.xlu0 %v73_v6, %s88_s4 }
  0x5f   :  { %v38_v8 = vpop.permute.xlu2 %37  }
  0x67   :  { %v45_v9 = vpop.permute.xlu2 %44  }
  0x74   :  { %v10_v10 = vpop.permute.xlu0 %9   ;;  %v24_v11 = vpop.permute.xlu1 %23  }
  0x75   :  { %12 = vst.msk [vmem:[#allocation0] ss:$8 sm:$0x3] %vm11_vm1, %v10_v10  }
  0x7c   :  { %v17_v12 = vpop.permute.xlu0 %16   ;;  %v31_v13 = vpop.permute.xlu1 %30  }
  0x7d   :  { %19 = vst.msk [vmem:[#allocation0] ss:$8 sm:$0x3] %vm18_vm2, %v17_v12  }
  0x7e   :  { %26 = vst.msk [vmem:[#allocation0] ss:$8 sm:$0x3] %vm25_vm3, %v24_v11  }
  0x7f   :  { %33 = vst.msk [vmem:[#allocation0] ss:$8 sm:$0x3] %vm32_vm4, %v31_v13  }
  0x80   :  { %40 = vst.msk [vmem:[#allocation0] ss:$8 sm:$0x3] %vm39_vm5, %v38_v8  }
  0x81   :  { %47 = vst.msk [vmem:[#allocation0] ss:$8 sm:$0x3] %vm46_vm6, %v45_v9  }
  0x84   :  { %v52_v14 = vpop.permute.xlu0 %51  }
  0x85   :  { %54 = vst.msk [vmem:[#allocation0] ss:$8 sm:$0x3] %vm53_vm7, %v52_v14  }
  0x8c   :  { %v57_v15 = vld [vmem:[#allocation0] sm:$0x1]  ;;  %v62_v16 = vld [vmem:[#allocation0 + $0x8] sm:$0x1] }
  0x8d   :  { %60 = vst [vmem:[%s130_s1] sm:$0x1] %v57_v15 }
  0x8e   :  { %74 = vst [vmem:[%s130_s1 + $0x1] sm:$0x1] %v62_v16 }

// kernel: simple_cnn_forward.1
= control target key start
LH: loop header
LB: loop body
LE: loop exit
PB: predicated region body
PF: predicated region fallthrough
CT: control target
= control target key end

     0   :  { %vm99_vm0 = vcmask 523264   ;;  %vm336_vm1 = vcmask 130048   ;;  %vm382_vm2 = vcmask 1040384   ;;  %vm395_vm6 = vcmask 1046528   ;;  %s1030_s1 = inlined_call_operand.vmem [shape: f32[192,256], index: 1, kind: input, shape index: {}]   ;;  %s1031_s0 = inlined_call_operand.vmem [shape: f32[32,192], index: 0, kind: input, shape index: {}]   ;;  %s1032_s3 = inlined_call_operand.vmem [shape: f32[256,16], index: 3, kind: input, shape index: {}]   ;;  %s1033_s4 = inlined_call_operand.vmem [shape: f32[1,16], index: 4, kind: input, shape index: {}]   ;;  %s1034_s2 = inlined_call_operand.vmem [shape: f32[1,256], index: 2, kind: input, shape index: {}]   ;;  %s1035_s5 = inlined_call_operand.vmem [shape: f32[16,48], index: 5, kind: input, shape index: {}]   ;;  %s1036_s6 = inlined_call_operand.vmem [shape: f32[1,16], index: 6, kind: input, shape index: {}]   ;;  %s1037_s7 = inlined_call_operand.vmem [shape: f32[2,32], index: 7, kind: input, shape index: {}]   ;;  %s1038_s8 = inlined_call_operand.vmem [shape: f32[16,1], index: 8, kind: input, shape index: {}]   ;;  %s1039_s9 = inlined_call_operand.<no memory space> [shape: f32[1,1], index: 9, kind: input, shape index: {}]   ;;  %s1040_s10 = inlined_call_operand.vmem [shape: f32[2,1], index: 10, kind: output, shape index: {}]  }
   0x1   :  { %v76_v0 = vld [vmem:[%s1030_s1 + $0xf8] sm:$0xff]  ;;  %v74_v1 = vld [vmem:[%s1030_s1 + $0xe8] sm:$0xff]  ;;  %v75_v2 = vld [vmem:[%s1030_s1 + $0xf0] sm:$0xff]  ;;  %vm542_vm8 = vcmask 261120   ;;  %vm614_vm12 = vcmask 1024  }
   0x2   :  { %170 = vmatpush.msra.mxu2 %v76_v0  ;;  %v72_v3 = vld [vmem:[%s1030_s1 + $0xd8] sm:$0xff]  ;;  %112 = vmatpush.msra.mxu0 %v75_v2  ;;  %v73_v4 = vld [vmem:[%s1030_s1 + $0xe0] sm:$0xff]  ;;  %v71_v5 = vld [vmem:[%s1030_s1 + $0xd0] sm:$0xff] }
   0x3   :  { %v70_v6 = vld [vmem:[%s1030_s1 + $0xc8] sm:$0xff]  ;;  %v69_v7 = vld [vmem:[%s1030_s1 + $0xc0] sm:$0xff]  ;;  %v92_v8 = vld [vmem:[%s1030_s1 + $0x178] sm:$0xff] }
   0x4   :  { %171 = vmatpush.msra.mxu2 %v74_v1  ;;  %113 = vmatpush.msra.mxu0 %v73_v4  ;;  %v68_v9 = vld [vmem:[%s1030_s1 + $0xb8] sm:$0xff]  ;;  %v90_v10 = vld [vmem:[%s1030_s1 + $0x168] sm:$0xff]  ;;  %v67_v11 = vld [vmem:[%s1030_s1 + $0xb0] sm:$0xff] }
   0x5   :  { %207 = vmatpush.msra.mxu3 %v92_v8  ;;  %v88_v12 = vld [vmem:[%s1030_s1 + $0x158] sm:$0xff]  ;;  %v66_v13 = vld [vmem:[%s1030_s1 + $0xa8] sm:$0xff]  ;;  %v65_v14 = vld [vmem:[%s1030_s1 + $0xa0] sm:$0xff] }
   0x6   :  { %172 = vmatpush.msra.mxu2 %v72_v3  ;;  %114 = vmatpush.msra.mxu0 %v71_v5  ;;  %v86_v15 = vld [vmem:[%s1030_s1 + $0x148] sm:$0xff]  ;;  %v91_v16 = vld [vmem:[%s1030_s1 + $0x170] sm:$0xff]  ;;  %v64_v17 = vld [vmem:[%s1030_s1 + $0x98] sm:$0xff] }
   0x7   :  { %208 = vmatpush.msra.mxu3 %v90_v10  ;;  %v63_v18 = vld [vmem:[%s1030_s1 + $0x90] sm:$0xff]  ;;  %v84_v19 = vld [vmem:[%s1030_s1 + $0x138] sm:$0xff]  ;;  %149 = vmatpush.msra.mxu1 %v91_v16  ;;  %v89_v20 = vld [vmem:[%s1030_s1 + $0x160] sm:$0xff] }
   0x8   :  { %173 = vmatpush.msra.mxu2 %v70_v6  ;;  %115 = vmatpush.msra.mxu0 %v69_v7  ;;  %v62_v21 = vld [vmem:[%s1030_s1 + $0x88] sm:$0xff]  ;;  %v87_v22 = vld [vmem:[%s1030_s1 + $0x150] sm:$0xff]  ;;  %v61_v23 = vld [vmem:[%s1030_s1 + $0x80] sm:$0xff] }
   0x9   :  { %209 = vmatpush.msra.mxu3 %v88_v12  ;;  %v82_v24 = vld [vmem:[%s1030_s1 + $0x128] sm:$0xff]  ;;  %150 = vmatpush.msra.mxu1 %v89_v20  ;;  %v60_v25 = vld [vmem:[%s1030_s1 + $0x78] sm:$0xff]  ;;  %v85_v26 = vld [vmem:[%s1030_s1 + $0x140] sm:$0xff] }
   0xa   :  { %174 = vmatpush.msra.mxu2 %v68_v9  ;;  %116 = vmatpush.msra.mxu0 %v67_v11  ;;  %v59_v27 = vld [vmem:[%s1030_s1 + $0x70] sm:$0xff]  ;;  %v80_v28 = vld [vmem:[%s1030_s1 + $0x118] sm:$0xff]  ;;  %v58_v29 = vld [vmem:[%s1030_s1 + $0x68] sm:$0xff] }
   0xb   :  { %210 = vmatpush.msra.mxu3 %v86_v15  ;;  %151 = vmatpush.msra.mxu1 %v87_v22  ;;  %v83_v30 = vld [vmem:[%s1030_s1 + $0x130] sm:$0xff]  ;;  %v57_v31 = vld [vmem:[%s1030_s1 + $0x60] sm:$0xff]  ;;  %v78_v32 = vld [vmem:[%s1030_s1 + $0x108] sm:$0xff] }
   0xc   :  { %175 = vmatpush.msra.mxu2 %v66_v13  ;;  %117 = vmatpush.msra.mxu0 %v65_v14  ;;  %v56_v33 = vld [vmem:[%s1030_s1 + $0x58] sm:$0xff]  ;;  %v38_v34 = vld [vmem:[%s1031_s0 + $0x8] sm:$0xff]  ;;  %v55_v35 = vld [vmem:[%s1030_s1 + $0x50] sm:$0xff] }
   0xd   :  { %211 = vmatpush.msra.mxu3 %v84_v19  ;;  %152 = vmatpush.msra.mxu1 %v85_v26  ;;  %v81_v36 = vld [vmem:[%s1030_s1 + $0x120] sm:$0xff]  ;;  %v54_v37 = vld [vmem:[%s1030_s1 + $0x48] sm:$0xff]  ;;  %v79_v39 = vld [vmem:[%s1030_s1 + $0x110] sm:$0xff] }
   0xe   :  { %176 = vmatpush.msra.mxu2 %v64_v17  ;;  %118 = vmatpush.msra.mxu0 %v63_v18  ;;  %v53_v38 = vld [vmem:[%s1030_s1 + $0x40] sm:$0xff]  ;;  %v52_v40 = vld [vmem:[%s1030_s1 + $0x38] sm:$0xff]  ;;  %v51_v41 = vld [vmem:[%s1030_s1 + $0x30] sm:$0xff] }
   0xf   :  { %212 = vmatpush.msra.mxu3 %v82_v24  ;;  %153 = vmatpush.msra.mxu1 %v83_v30  ;;  %v77_v42 = vld [vmem:[%s1030_s1 + $0x100] sm:$0xff]  ;;  %v50_v43 = vld [vmem:[%s1030_s1 + $0x28] sm:$0xff]  ;;  %v267_v45 = vld [vmem:[%s1032_s3 + $0xf8] sm:$0xff] }
  0x10   :  { %177 = vmatpush.msra.mxu2 %v62_v21  ;;  %119 = vmatpush.msra.mxu0 %v61_v23  ;;  %v49_v44 = vld [vmem:[%s1030_s1 + $0x20] sm:$0xff]  ;;  %v48_v46 = vld [vmem:[%s1030_s1 + $0x18] sm:$0xff]  ;;  %v47_v48 = vld [vmem:[%s1030_s1 + $0x10] sm:$0xff] }
  0x11   :  { %213 = vmatpush.msra.mxu3 %v80_v28  ;;  %154 = vmatpush.msra.mxu1 %v81_v36  ;;  %v40_v47 = vld [vmem:[%s1031_s0 + $0x18] sm:$0xff]  ;;  %v266_v49 = vld [vmem:[%s1032_s3 + $0xf0] sm:$0xff]  ;;  %v46_v50 = vld [vmem:[%s1030_s1 + $0x8] sm:$0xff] }
  0x12   :  { %178 = vmatpush.msra.mxu2 %v60_v25  ;;  %120 = vmatpush.msra.mxu0 %v59_v27  ;;  %v251_v51 = vld [vmem:[%s1032_s3 + $0x78] sm:$0xff]  ;;  %v37_v52 = vld [vmem:[%s1031_s0] sm:$0xff]  ;;  %v265_v54 = vld [vmem:[%s1032_s3 + $0xe8] sm:$0xff] }
  0x13   :  { %214 = vmatpush.msra.mxu3 %v78_v32  ;;  %155 = vmatpush.msra.mxu1 %v79_v39  ;;  %v45_v53 = vld [vmem:[%s1030_s1] sm:$0xff]  ;;  %v250_v55 = vld [vmem:[%s1032_s3 + $0x70] sm:$0xff]  ;;  %v249_v57 = vld [vmem:[%s1032_s3 + $0x68] sm:$0xff] }
  0x14   :  { %179 = vmatpush.msra.mxu2 %v58_v29  ;;  %121 = vmatpush.msra.mxu0 %v57_v31  ;;  %v264_v56 = vld [vmem:[%s1032_s3 + $0xe0] sm:$0xff]  ;;  %v42_v58 = vld [vmem:[%s1031_s0 + $0x28] sm:$0xff]  ;;  %v263_v59 = vld [vmem:[%s1032_s3 + $0xd8] sm:$0xff] }
  0x15   :  { %624 = vmatmul.msk.f32.vlgmr.msra.gmra.mxu3 %vm99_vm0, %v38_v34  ;;  %156 = vmatpush.msra.mxu1 %v77_v42  ;;  %v248_v60 = vld [vmem:[%s1032_s3 + $0x60] sm:$0xff]  ;;  %v39_v61 = vld [vmem:[%s1031_s0 + $0x10] sm:$0xff]  ;;  %v247_v63 = vld [vmem:[%s1032_s3 + $0x58] sm:$0xff] }
  0x16   :  { %180 = vmatpush.msra.mxu2 %v56_v33  ;;  %122 = vmatpush.msra.mxu0 %v55_v35  ;;  %v262_v62 = vld [vmem:[%s1032_s3 + $0xd0] sm:$0xff]  ;;  %v261_v0 = vld [vmem:[%s1032_s3 + $0xc8] sm:$0xff]  ;;  %v260_v2 = vld [vmem:[%s1032_s3 + $0xc0] sm:$0xff] }
  0x17   :  { %620 = vmatmul.msk.f32.vlgmr.msra.gmra.mxu1 %vm99_vm0, %v38_v34  ;;  %301 = vmatpush.msrb.mxu3 %v267_v45  ;;  %v246_v1 = vld [vmem:[%s1032_s3 + $0x50] sm:$0xff]  ;;  %v44_v3 = vld [vmem:[%s1031_s0 + $0x38] sm:$0xff]  ;;  %v245_v4 = vld [vmem:[%s1032_s3 + $0x48] sm:$0xff] }
  0x18   :  { %181 = vmatpush.msra.mxu2 %v54_v37  ;;  %123 = vmatpush.msra.mxu0 %v53_v38  ;;  %v259_v5 = vld [vmem:[%s1032_s3 + $0xb8] sm:$0xff]  ;;  %v41_v6 = vld [vmem:[%s1031_s0 + $0x20] sm:$0xff]  ;;  %v258_v8 = vld [vmem:[%s1032_s3 + $0xb0] sm:$0xff] }
  0x19   :  { %302 = vmatpush.msrb.mxu3 %v266_v49  ;;  %272 = vmatpush.msrb.mxu1 %v251_v51  ;;  %v244_v7 = vld [vmem:[%s1032_s3 + $0x40] sm:$0xff]  ;;  %v243_v9 = vld [vmem:[%s1032_s3 + $0x38] sm:$0xff]  ;;  %v257_v10 = vld [vmem:[%s1032_s3 + $0xa8] sm:$0xff] }
  0x1a   :  { %182 = vmatpush.msra.mxu2 %v52_v40  ;;  %124 = vmatpush.msra.mxu0 %v51_v41  ;;  %v242_v11 = vld [vmem:[%s1032_s3 + $0x30] sm:$0xff]  ;;  %v256_v12 = vld [vmem:[%s1032_s3 + $0xa0] sm:$0xff]  ;;  %v241_v14 = vld [vmem:[%s1032_s3 + $0x28] sm:$0xff] }
  0x1b   :  { %303 = vmatpush.msrb.mxu3 %v265_v54  ;;  %273 = vmatpush.msrb.mxu1 %v250_v55  ;;  %v43_v13 = vld [vmem:[%s1031_s0 + $0x30] sm:$0xff]  ;;  %v255_v15 = vld [vmem:[%s1032_s3 + $0x98] sm:$0xff]  ;;  %v240_v16 = vld [vmem:[%s1032_s3 + $0x20] sm:$0xff] }
  0x1c   :  { %183 = vmatpush.msra.mxu2 %v50_v43  ;;  %125 = vmatpush.msra.mxu0 %v49_v44  ;;  %v254_v17 = vld [vmem:[%s1032_s3 + $0x90] sm:$0xff]  ;;  %v239_v18 = vld [vmem:[%s1032_s3 + $0x18] sm:$0xff]  ;;  %v253_v19 = vld [vmem:[%s1032_s3 + $0x88] sm:$0xff] }
  0x1d   :  { %625 = vmatmul.msk.f32.gmra.mxu3 %vm99_vm0, %v40_v47  ;;  %274 = vmatpush.msrb.mxu1 %v249_v57  ;;  %v238_v20 = vld [vmem:[%s1032_s3 + $0x10] sm:$0xff]  ;;  %v252_v21 = vld [vmem:[%s1032_s3 + $0x80] sm:$0xff]  ;;  %v237_v22 = vld [vmem:[%s1032_s3 + $0x8] sm:$0xff] }
  0x1e   :  { %184 = vmatpush.msra.mxu2 %v48_v46  ;;  %126 = vmatpush.msra.mxu0 %v47_v48  ;;  %v236_v23 = vld [vmem:[%s1032_s3] sm:$0xff] }
  0x1f   :  { %621 = vmatmul.msk.f32.gmra.mxu1 %vm99_vm0, %v40_v47  ;;  %304 = vmatpush.msrb.mxu3 %v264_v56  ;;  %v93_v25 = vld [vmem:[%s1034_s2] sm:$0x3] }
  0x20   :  { %185 = vmatpush.msra.mxu2 %v46_v50  ;;  %127 = vmatpush.msra.mxu0 %v45_v53  ;;  %v95_v26 = vperm.slane %v93_v25, 0  ;;  %v96_v30 = vperm.slane %v93_v25, 1 }
  0x21   :  { %186 = vmatmul.f32.vlgmr.msra.gmra.mxu2 %v37_v52  ;;  %128 = vmatmul.f32.vlgmr.msra.gmra.mxu0 %v37_v52 }
  0x22   :  { %305 = vmatpush.msrb.mxu3 %v263_v59  ;;  %275 = vmatpush.msrb.mxu1 %v248_v60 }
  0x24   :  { %306 = vmatpush.msrb.mxu3 %v262_v62  ;;  %276 = vmatpush.msrb.mxu1 %v247_v63 }
  0x25   :  { %626 = vmatmul.msk.f32.gmra.mxu3 %vm99_vm0, %v42_v58 }
  0x26   :  { %307 = vmatpush.msrb.mxu3 %v261_v0  ;;  %277 = vmatpush.msrb.mxu1 %v246_v1 }
  0x27   :  { %622 = vmatmul.msk.f32.gmra.mxu1 %vm99_vm0, %v42_v58 }
  0x28   :  { %308 = vmatpush.msrb.mxu3 %v260_v2  ;;  %278 = vmatpush.msrb.mxu1 %v245_v4  ;;  %v334_v4 = vld [vmem:[%s1035_s5] sm:$0xff] }
  0x29   :  { %189 = vmatmul.f32.gmra.mxu2 %v39_v61  ;;  %131 = vmatmul.f32.gmra.mxu0 %v39_v61 }
  0x2a   :  { %309 = vmatpush.msrb.mxu3 %v259_v5  ;;  %279 = vmatpush.msrb.mxu1 %v244_v7 }
  0x2c   :  { %310 = vmatpush.msrb.mxu3 %v258_v8  ;;  %280 = vmatpush.msrb.mxu1 %v243_v9 }
  0x2d   :  { %627 = vmatmul.msk.f32.gmra.mxu3 %vm99_vm0, %v44_v3 }
  0x2e   :  { %311 = vmatpush.msrb.mxu3 %v257_v10  ;;  %281 = vmatpush.msrb.mxu1 %v242_v11 }
  0x2f   :  { %623 = vmatmul.msk.f32.gmra.mxu1 %vm99_vm0, %v44_v3  ;;  %v335_v3 = vld [vmem:[%s1035_s5 + $0x8] sm:$0xff]  ;;  %s647_s5 = smov 96  }
  0x30   :  { %312 = vmatpush.msrb.mxu3 %v256_v12  ;;  %282 = vmatpush.msrb.mxu1 %v241_v14 }
  0x31   :  { %192 = vmatmul.f32.gmra.mxu2 %v41_v6  ;;  %134 = vmatmul.f32.gmra.mxu0 %v41_v6  ;;  %v639_v6 = vld [vmem:[%s1033_s4] ss:$0 sm:$0xff]  ;;  %s646_s4 = smov 112  }
  0x32   :  { %313 = vmatpush.msrb.mxu3 %v255_v15  ;;  %283 = vmatpush.msrb.mxu1 %v240_v16 }
  0x33   :  { %363 = vmatpush.msrb.mxu0 %v335_v3 }
  0x34   :  { %314 = vmatpush.msrb.mxu3 %v254_v17  ;;  %284 = vmatpush.msrb.mxu1 %v239_v18 }
  0x35   :  { %364 = vmatpush.msrb.mxu0 %v334_v4 }
  0x36   :  { %315 = vmatpush.msrb.mxu3 %v253_v19  ;;  %285 = vmatpush.msrb.mxu1 %v238_v20 }
  0x38   :  { %316 = vmatpush.msrb.mxu3 %v252_v21  ;;  %286 = vmatpush.msrb.mxu1 %v237_v22 }
  0x39   :  { %195 = vmatmul.f32.gmra.mxu2 %v43_v13  ;;  %137 = vmatmul.f32.gmra.mxu0 %v43_v13 }
  0x3a   :  { %287 = vmatpush.msrb.mxu1 %v236_v23 }
  0x3c   :  { %635 = vmatpush.msra.mxu1 %v335_v3 }
  0x3e   :  { %636 = vmatpush.msra.mxu1 %v334_v4  ;;  %v640_v4 = vld [vmem:[%s1036_s6] ss:$0 sm:$0xff] }
  0x94   :  { %v158_v24 = vpop.f32.mrf.mxu1 }
  0x98   :  { %v216_v27 = vpop.f32.mrf.mxu3 }
  0x9c   :  { %v161_v32 = vpop.f32.mrf.mxu1 }
  0x9e   :  { %v129_v28 = vpop.f32.mrf.mxu0 }
  0x9f   :  { %v130_v29 = vadd.f32 %v129_v28, %v95_v26 }
  0xa0   :  { %v219_v38 = vpop.f32.mrf.mxu3 }
  0xa1   :  { %v159_v31 = vadd.f32 %v158_v24, %v130_v29 }
  0xa3   :  { %v228_v34 = vmax.f32 %v159_v31, 0.0 }
  0xa4   :  { %v187_v33 = vpop.f32.mrf.mxu2  ;;  %v164_v45 = vpop.f32.mrf.mxu1 }
  0xa5   :  { %v188_v35 = vadd.f32 %v187_v33, %v96_v30  ;;  %288 = vmatmul.f32.vlgmr.msrb.gmra.mxu1 %v228_v34 }
  0xa6   :  { %v132_v37 = vpop.f32.mrf.mxu0 }
  0xa7   :  { %v217_v36 = vadd.f32 %v216_v27, %v188_v35  ;;  %v133_v39 = vadd.f32 %v132_v37, %v95_v26 }
  0xa8   :  { %v222_v50 = vpop.f32.mrf.mxu3 }
  0xa9   :  { %v229_v40 = vmax.f32 %v217_v36, 0.0  ;;  %v162_v41 = vadd.f32 %v161_v32, %v133_v39 }
  0xab   :  { %317 = vmatmul.f32.vlgmr.msrb.gmra.mxu3 %v229_v40  ;;  %v230_v43 = vmax.f32 %v162_v41, 0.0 }
  0xac   :  { %v190_v42 = vpop.f32.mrf.mxu2  ;;  %v167_v57 = vpop.f32.mrf.mxu1 }
  0xad   :  { %v191_v44 = vadd.f32 %v190_v42, %v96_v30  ;;  %291 = vmatmul.f32.gmra.mxu1 %v230_v43 }
  0xae   :  { %v135_v47 = vpop.f32.mrf.mxu0 }
  0xaf   :  { %v220_v46 = vadd.f32 %v219_v38, %v191_v44  ;;  %v136_v48 = vadd.f32 %v135_v47, %v95_v26 }
  0xb0   :  { %v225_v62 = vpop.f32.mrf.mxu3 }
  0xb1   :  { %v231_v49 = vmax.f32 %v220_v46, 0.0  ;;  %v165_v51 = vadd.f32 %v164_v45, %v136_v48 }
  0xb3   :  { %320 = vmatmul.f32.gmra.mxu3 %v231_v49  ;;  %v232_v53 = vmax.f32 %v165_v51, 0.0 }
  0xb4   :  { %v193_v52 = vpop.f32.mrf.mxu2 }
  0xb5   :  { %v194_v54 = vadd.f32 %v193_v52, %v96_v30  ;;  %294 = vmatmul.f32.gmra.mxu1 %v232_v53 }
  0xb6   :  { %v138_v56 = vpop.f32.mrf.mxu0 }
  0xb7   :  { %v223_v55 = vadd.f32 %v222_v50, %v194_v54  ;;  %v139_v58 = vadd.f32 %v138_v56, %v95_v26  ;;  %v408_v26 = vlaneseq }
  0xb9   :  { %v233_v59 = vmax.f32 %v223_v55, 0.0  ;;  %v168_v60 = vadd.f32 %v167_v57, %v139_v58  ;;  %v409_v27 = vshrl.u32 %v408_v26, 7 }
  0xbb   :  { %323 = vmatmul.f32.gmra.mxu3 %v233_v59  ;;  %v234_v63 = vmax.f32 %v168_v60, 0.0  ;;  %v417_v28 = vand.u32 15, %v409_v27  ;;  %v411_v36 = vadd.s32 16, %v409_v27  ;;  %v412_v41 = vadd.s32 24, %v409_v27 }
  0xbc   :  { %v196_v61 = vpop.f32.mrf.mxu2  ;;  %v410_v44 = vadd.s32 8, %v409_v27 }
  0xbd   :  { %v197_v0 = vadd.f32 %v196_v61, %v96_v30  ;;  %297 = vmatmul.f32.gmra.mxu1 %v234_v63  ;;  %vm991_vm3 = vcmp.eq.s32.totalorder %v417_v28, 0  ;;  %v431_v38 = vand.u32 15, %v411_v36  ;;  %v438_v46 = vand.u32 15, %v412_v41 }
  0xbe   :  { %v424_v48 = vand.u32 15, %v410_v44 }
  0xbf   :  { %v226_v1 = vadd.f32 %v225_v62, %v197_v0  ;;  %vm1001_vm4 = vcmp.eq.s32.totalorder %v431_v38, 0  ;;  %vm480_vm5 = vcmp.eq.s32.totalorder %v438_v46, 15 }
  0xc0   :  { %vm478_vm7 = vcmp.eq.s32.totalorder %v424_v48, 15 }
  0xc1   :  { %v235_v2 = vmax.f32 %v226_v1, 0.0 }
  0xc3   :  { %326 = vmatmul.f32.gmra.mxu3 %v235_v2 }
 0x122   :  { %v289_v5 = vpop.f32.mrf.mxu1 }
 0x123   :  { %v290_v7 = vadd.f32 %v639_v6, %v289_v5 }
 0x12a   :  { %v292_v8 = vpop.f32.mrf.mxu1 }
 0x12b   :  { %v293_v12 = vadd.f32 %v639_v6, %v292_v8 }
 0x12e   :  { %v318_v9 = vpop.f32.mrf.mxu3 }
 0x12f   :  { %v319_v10 = vadd.f32 %v318_v9, %v290_v7 }
 0x131   :  { %v330_v11 = vmax.f32 %v319_v10, 0.0 }
 0x132   :  { %v295_v14 = vpop.f32.mrf.mxu1 }
 0x133   :  { %628 = vmatmul.msk.f32.vlgmr.msrb.gmra.mxu0 %vm336_vm1, %v330_v11  ;;  %v296_v17 = vadd.f32 %v639_v6, %v295_v14 }
 0x136   :  { %v321_v13 = vpop.f32.mrf.mxu3 }
 0x137   :  { %v322_v15 = vadd.f32 %v321_v13, %v293_v12 }
 0x139   :  { %v331_v16 = vmax.f32 %v322_v15, 0.0 }
 0x13a   :  { %v298_v20 = vpop.f32.mrf.mxu1 }
 0x13b   :  { %629 = vmatmul.msk.f32.gmra.mxu0 %vm336_vm1, %v331_v16  ;;  %v299_v22 = vadd.f32 %v639_v6, %v298_v20 }
 0x13e   :  { %v324_v18 = vpop.f32.mrf.mxu3 }
 0x13f   :  { %v325_v19 = vadd.f32 %v324_v18, %v296_v17 }
 0x141   :  { %v332_v21 = vmax.f32 %v325_v19, 0.0 }
 0x143   :  { %630 = vmatmul.msk.f32.gmra.mxu0 %vm336_vm1, %v332_v21 }
 0x146   :  { %v327_v23 = vpop.f32.mrf.mxu3 }
 0x147   :  { %v328_v24 = vadd.f32 %v327_v23, %v299_v22  ;;  %v541_v22 = vld [vmem:[%s1037_s7] sm:$0x3]  ;;  %v567_v23 = vld [vmem:[%s1038_s8 + $0x8] sm:$0xff] }
 0x149   :  { %v333_v25 = vmax.f32 %v328_v24, 0.0  ;;  %v566_v24 = vld [vmem:[%s1038_s8] sm:$0xff] }
 0x14b   :  { %631 = vmatmul.msk.f32.vlgmr.msra.gmra.mxu1 %vm336_vm1, %v333_v25  ;;  %v15_v25 = vstv %s1039_s9 }
 0x14c   :  { %16 = vst [vmem:[#allocation2] sm:$0x1] %v15_v25 }
 0x153   :  { %v641_v27 = vld [vmem:[#allocation2] ss:$0 sm:$0xff] }
 0x1b0   :  { %v366_v29 = vpop.f32.mrf.mxu0 }
 0x1b1   :  { %v383_v30 = vrot.slane %v366_v29, 7  ;;  %v396_v59 = vrot.slane %v366_v29, 1 }
 0x1b3   :  { %v394_v32 = vsel %vm382_vm2, 0.0, %v383_v30 }
 0x1b4   :  { %v473_v33 = vsel %vm991_vm3, 0.0, %v394_v32 }
 0x1b8   :  { %v369_v34 = vpop.f32.mrf.mxu0 }
 0x1b9   :  { %v384_v35 = vrot.slane %v369_v34, 7  ;;  %495 = vrot.lane.b32.xlu1 %v369_v34, %s646_s4  ;;  %v397_v52 = vrot.slane %v369_v34, 1 }
 0x1bb   :  { %v385_v37 = vsel %vm382_vm2, %v383_v30, %v384_v35  ;;  %v398_v60 = vsel %vm395_vm6, %v396_v59, %v397_v52 }
 0x1c0   :  { %v372_v39 = vpop.f32.mrf.mxu0 }
 0x1c1   :  { %v386_v40 = vrot.slane %v372_v39, 7  ;;  %497 = vrot.lane.b32.xlu0 %v372_v39, %s646_s4  ;;  %v399_v49 = vrot.slane %v372_v39, 1 }
 0x1c3   :  { %v387_v43 = vsel %vm382_vm2, %v384_v35, %v386_v40  ;;  %v400_v57 = vsel %vm395_vm6, %v397_v52, %v399_v49 }
 0x1c4   :  { %v475_v45 = vsel %vm1001_vm4, 0.0, %v387_v43  ;;  %v490_v58 = vsel %vm478_vm7, 0.0, %v400_v57 }
 0x1c8   :  { %v375_v47 = vpop.f32.mrf.mxu1 }
 0x1c9   :  { %v388_v50 = vrot.slane %v375_v47, 7  ;;  %v401_v51 = vrot.slane %v375_v47, 1  ;;  %499 = vrot.lane.b32.xlu0 %v375_v47, %s646_s4 }
 0x1cb   :  { %v402_v53 = vsel %vm395_vm6, %v399_v49, %v401_v51  ;;  %v407_v54 = vsel %vm395_vm6, %v401_v51, 0.0  ;;  %v389_v55 = vsel %vm382_vm2, %v386_v40, %v388_v50 }
 0x1cc   :  { %517 = vrot.lane.b32.xlu2 %v402_v53, %s647_s5  ;;  %v492_v56 = vsel %vm480_vm5, 0.0, %v407_v54 }
 0x1cd   :  { %519 = vrot.lane.b32.xlu1 %v492_v56, %s647_s5 }
 0x1d1   :  { %515 = vrot.lane.b32.xlu0 %v490_v58, %s647_s5 }
 0x1d4   :  { %493 = vrot.lane.b32.xlu2 %v366_v29, %s646_s4 }
 0x1d5   :  { %513 = vrot.lane.b32.xlu1 %v398_v60, %s647_s5 }
 0x226   :  { %v518_v63 = vpop.permute.xlu2 %517 }
 0x22b   :  { %v496_v62 = vpop.permute.xlu1 %495 }
 0x22c   :  { %v506_v7 = vadd.f32 %v496_v62, %v385_v37 }
 0x22e   :  { %v494_v10 = vpop.permute.xlu2 %493 }
 0x22f   :  { %v505_v14 = vadd.f32 %v494_v10, %v473_v33 }
 0x233   :  { %v498_v61 = vpop.permute.xlu0 %497 }
 0x234   :  { %v507_v0 = vadd.f32 %v498_v61, %v475_v45 }
 0x236   :  { %v527_v2 = vadd.f32 %v518_v63, %v507_v0 }
 0x238   :  { %v535_v9 = vadd.f32 %v640_v4, %v527_v2 }
 0x23a   :  { %v539_v15 = vmax.f32 %v535_v9, 0.0 }
 0x23b   :  { %v500_v1 = vpop.permute.xlu0 %499 }
 0x23c   :  { %v508_v3 = vadd.f32 %v500_v1, %v389_v55 }
 0x23f   :  { %v520_v5 = vpop.permute.xlu1 %519 }
 0x240   :  { %v528_v6 = vadd.f32 %v520_v5, %v508_v3 }
 0x242   :  { %v536_v8 = vadd.f32 %v640_v4, %v528_v6 }
 0x243   :  { %v516_v11 = vpop.permute.xlu0 %515 }
 0x244   :  { %v526_v12 = vadd.f32 %v516_v11, %v506_v7  ;;  %v540_v13 = vmax.f32 %v536_v8, 0.0 }
 0x246   :  { %558 = vmatpush.msrb.mxu2 %v540_v13  ;;  %v534_v16 = vadd.f32 %v640_v4, %v526_v12 }
 0x247   :  { %v514_v17 = vpop.permute.xlu1 %513 }
 0x248   :  { %v525_v18 = vadd.f32 %v514_v17, %v505_v14  ;;  %559 = vmatpush.msrb.mxu2 %v539_v15  ;;  %v538_v19 = vmax.f32 %v534_v16, 0.0 }
 0x24a   :  { %560 = vmatpush.msrb.mxu2 %v538_v19  ;;  %v533_v20 = vadd.f32 %v640_v4, %v525_v18 }
 0x24c   :  { %v537_v21 = vmax.f32 %v533_v20, 0.0 }
 0x24e   :  { %561 = vmatpush.msrb.mxu2 %v537_v21 }
 0x24f   :  { %632 = vmatmul.msk.f32.vlgmr.msrb.gmra.mxu2 %vm542_vm8, %v541_v22 }
 0x250   :  { %589 = vmatpush.msra.mxu2 %v567_v23 }
 0x252   :  { %590 = vmatpush.msra.mxu2 %v566_v24 }
 0x2d2   :  { %v563_v26 = vpop.f32.mrf.mxu2 }
 0x2d3   :  { %633 = vmatmul.msk.f32.vlgmr.msra.gmra.mxu2 %vm336_vm1, %v563_v26 }
 0x356   :  { %v592_v28 = vpop.f32.mrf.mxu2 }
 0x357   :  { %v593_v29 = vadd.f32 %v641_v27, %v592_v28 }
 0x359   :  { %v634_v30 = vmul.f32 -1.442695, %v593_v29 }
 0x35b   :  { %642 = vpow2.f32 %v634_v30 }
 0x361   :  { %v643_v31 = vpop.eup %642 }
 0x362   :  { %v598_v32 = vadd.f32 1.0, %v643_v31 }
 0x364   :  { %644 = vrcp.f32 %v598_v32  ;;  %v610_v36 = vand.u32 2147483648, %v598_v32  ;;  %v608_v38 = vand.u32 2147483647, %v598_v32  ;;  %vm604_vm10 = vweird.f32 %v598_v32 }
 0x366   :  { %v611_v40 = vor.u32 1.1754944e-38, %v610_v36  ;;  %vm609_vm13 = vcmp.eq.f32.partialorder %v608_v38, 8.507059e+37 }
 0x36a   :  { %v645_v33 = vpop.eup %644 }
 0x36b   :  { %v600_v34 = vmul.f32 %v645_v33, %v598_v32  ;;  %vm605_vm9 = vweird.f32 %v645_v33 }
 0x36c   :  { %vm606_vm11 = vmor %vm604_vm10, %vm605_vm9 }
 0x36d   :  { %v601_v35 = vsub.f32 1.0, %v600_v34 }
 0x36f   :  { %v602_v37 = vmul.f32 %v645_v33, %v601_v35 }
 0x371   :  { %v603_v39 = vadd.f32 %v645_v33, %v602_v37 }
 0x373   :  { %v607_v41 = vsel %vm606_vm11, %v645_v33, %v603_v39 }
 0x374   :  { %v612_v42 = vsel %vm609_vm13, %v611_v40, %v607_v41 }
 0x375   :  { %615 = vst.msk [vmem:[%s1040_s10] sm:$0x3] %vm614_vm12, %v612_v42 }

</bundles_post_ra>
